<compile_context>
chip_gen: v6e
topology: v6e:2x2x1
jax: 0.10.0
libtpu: 0.0.40
codegen_flags: <defaults>
</compile_context>

<pallas_src>
import functools

import jax
import jax.numpy as jnp
import numpy as np
from jax.experimental import pallas as pl
from jax.experimental.pallas import tpu as pltpu

LANE = 128
SUBLANE = 8


def _round_up(n, m):
    return ((n + m - 1) // m) * m


def vae_kernel(x_ref, eps_ref,
               w1_ref, b1_ref, wenc_ref, benc_ref,
               w3_ref, b3_ref, w4_ref, b4_ref,
               recon_ref, enc_ref, *, lp):
    x = x_ref[...]

    # ---- encode ----
    h1 = jnp.dot(x, w1_ref[...], preferred_element_type=jnp.float32) + b1_ref[...]
    h1 = jnp.maximum(h1, 0.0)
    # fused fc21|fc22 head: lanes [0, lp) = mu, lanes [lp, 2*lp) = logvar
    enc = jnp.dot(h1, wenc_ref[...], preferred_element_type=jnp.float32) + benc_ref[...]
    mu = enc[:, :lp]
    logvar = enc[:, lp:]

    # ---- reparameterize ----
    # padded latent lanes: mu=0, logvar=0 -> std=1, eps=0 -> z=0 (and w3 padded rows are 0 anyway)
    std = jnp.exp(0.5 * logvar)
    z = mu + eps_ref[...] * std

    # ---- decode ----
    h3 = jnp.dot(z, w3_ref[...], preferred_element_type=jnp.float32) + b3_ref[...]
    h3 = jnp.maximum(h3, 0.0)
    logits = jnp.dot(h3, w4_ref[...], preferred_element_type=jnp.float32) + b4_ref[...]

    recon_ref[...] = jax.nn.sigmoid(logits)
    enc_ref[...] = enc


def vae_forward(x, eps, params, *, tile_b=None):
    """Fused VAE forward. x: (B, input_dim), eps: (B, latent_dim).
    Returns (recon, mu, logvar) with the original (un-padded) shapes."""
    (w1, b1), (w21, b21), (w22, b22), (w3, b3), (w4, b4) = params
    B, D = x.shape
    H = w1.shape[1]
    L = w21.shape[1]

    Dp = _round_up(D, LANE)
    Hp = _round_up(H, LANE)
    Lp = _round_up(L, LANE)
    Bp = _round_up(B, SUBLANE)

    if tile_b is None:
        # Single grid step for small/medium batches.  For huge B (or to use both v7x TensorCores),
        # pass a smaller tile_b (multiple of 8, ideally >= 128) that divides the padded batch.
        tile_b = Bp
    assert Bp % tile_b == 0, "padded batch must be divisible by tile_b"
    assert tile_b % SUBLANE == 0, "tile_b must be a multiple of 8 (sublane)"

    f32 = jnp.float32

    def pad2(a, rows, cols):
        a = jnp.asarray(a, f32)
        return jnp.zeros((rows, cols), f32).at[:a.shape[0], :a.shape[1]].set(a)

    xp = pad2(x, Bp, Dp)
    epsp = pad2(eps, Bp, Lp)
    w1p, b1p = pad2(w1, Dp, Hp), pad2(b1, 1, Hp)
    # fused encoder head weights / bias: [w21 | w22], lane-aligned at Lp
    wenc = (jnp.zeros((Hp, 2 * Lp), f32)
            .at[:H, :L].set(jnp.asarray(w21, f32))
            .at[:H, Lp:Lp + L].set(jnp.asarray(w22, f32)))
    benc = (jnp.zeros((1, 2 * Lp), f32)
            .at[:, :L].set(jnp.asarray(b21, f32))
            .at[:, Lp:Lp + L].set(jnp.asarray(b22, f32)))
    w3p, b3p = pad2(w3, Lp, Hp), pad2(b3, 1, Hp)
    w4p, b4p = pad2(w4, Hp, Dp), pad2(b4, 1, Dp)

    grid = (Bp // tile_b,)

    def batch_spec(feat):
        return pl.BlockSpec((tile_b, feat), lambda i: (i, 0))

    # Weights/biases: whole-array, VMEM-resident, no pipelining / double-buffering.
    def resident():
        return pl.BlockSpec(memory_space=pltpu.MemorySpace.VMEM)

    in_specs = [
        batch_spec(Dp),            # x
        batch_spec(Lp),            # eps
        resident(), resident(),    # fc1
        resident(), resident(),    # fused fc21|fc22
        resident(), resident(),    # fc3
        resident(), resident(),    # fc4
    ]
    out_specs = [batch_spec(Dp), batch_spec(2 * Lp)]
    out_shape = (
        jax.ShapeDtypeStruct((Bp, Dp), f32),        # recon (padded)
        jax.ShapeDtypeStruct((Bp, 2 * Lp), f32),    # [mu | logvar] (padded, lane-dense)
    )

    recon_p, enc_p = pl.pallas_call(
        functools.partial(vae_kernel, lp=Lp),
        grid=grid,
        in_specs=in_specs,
        out_specs=out_specs,
        out_shape=out_shape,
        compiler_params=pltpu.CompilerParams(
            dimension_semantics=("parallel",)),
    )(xp, epsp, w1p, b1p, wenc, benc, w3p, b3p, w4p, b4p)

    recon = recon_p[:B, :D]
    mu = enc_p[:B, :L]
    logvar = enc_p[:B, Lp:Lp + L]
    return recon, mu, logvar


def init_linear(key, fan_in, fan_out):
    """PyTorch nn.Linear default init: U(-1/sqrt(fan_in), 1/sqrt(fan_in)).
    Returned weight is already transposed to (fan_in, fan_out)."""
    kw, kb = jax.random.split(key)
    bound = 1.0 / np.sqrt(fan_in)
    w = jax.random.uniform(kw, (fan_in, fan_out), jnp.float32, -bound, bound)
    b = jax.random.uniform(kb, (1, fan_out), jnp.float32, -bound, bound)
    return w, b


def vae_reference(x, eps, params):
    """Plain-JAX reference mirroring the PyTorch forward."""
    (w1, b1), (w21, b21), (w22, b22), (w3, b3), (w4, b4) = params
    h1 = jnp.maximum(x @ w1 + b1, 0.0)
    mu = h1 @ w21 + b21
    logvar = h1 @ w22 + b22
    std = jnp.exp(0.5 * logvar)
    z = mu + eps * std
    h3 = jnp.maximum(z @ w3 + b3, 0.0)
    recon = jax.nn.sigmoid(h3 @ w4 + b4)
    return recon, mu, logvar


if __name__ == "__main__":
    # small shapes consistent with the module's forward
    B, INPUT_DIM, HIDDEN_DIM, LATENT_DIM = 64, 32, 64, 16

    key = jax.random.PRNGKey(0)
    kx, keps, k1, k2, k3, k4, k5 = jax.random.split(key, 7)

    # x.view(-1, x.shape[1]) is identity for 2D input
    x = jax.random.uniform(kx, (B, INPUT_DIM), jnp.float32)
    # TODO(synk): torch.randn_like(std) is drawn host-side here (deterministic vs reference);
    # pltpu.prng_seed + pltpu.stateful_normal could generate it in-kernel instead.
    eps = jax.random.normal(keps, (B, LATENT_DIM), jnp.float32)

    params = (
        init_linear(k1, INPUT_DIM, HIDDEN_DIM),    # fc1
        init_linear(k2, HIDDEN_DIM, LATENT_DIM),   # fc21
        init_linear(k3, HIDDEN_DIM, LATENT_DIM),   # fc22
        init_linear(k4, LATENT_DIM, HIDDEN_DIM),   # fc3
        init_linear(k5, HIDDEN_DIM, INPUT_DIM),    # fc4
    )

    recon, mu, logvar = jax.block_until_ready(vae_forward(x, eps, params))

    r_ref, mu_ref, lv_ref = vae_reference(x, eps, params)
    assert jnp.allclose(recon, r_ref, atol=1e-5), "recon mismatch"
    assert jnp.allclose(mu, mu_ref, atol=1e-5), "mu mismatch"
    assert jnp.allclose(logvar, lv_ref, atol=1e-5), "logvar mismatch"

    print("KERNEL_OK")
</pallas_src>

<mosaic_0001>
module attributes {stable_mosaic.version = 11 : i64} {
  func.func @vae_kernel(%arg0: i32, %arg1: memref<64x128xf32, #tpu.memory_space<vmem>>, %arg2: memref<64x128xf32, #tpu.memory_space<vmem>>, %arg3: memref<128x128xf32, #tpu.memory_space<vmem>>, %arg4: memref<1x128xf32, #tpu.memory_space<vmem>>, %arg5: memref<128x256xf32, #tpu.memory_space<vmem>>, %arg6: memref<1x256xf32, #tpu.memory_space<vmem>>, %arg7: memref<128x128xf32, #tpu.memory_space<vmem>>, %arg8: memref<1x128xf32, #tpu.memory_space<vmem>>, %arg9: memref<128x128xf32, #tpu.memory_space<vmem>>, %arg10: memref<1x128xf32, #tpu.memory_space<vmem>>, %arg11: memref<64x128xf32, #tpu.memory_space<vmem>>, %arg12: memref<64x256xf32, #tpu.memory_space<vmem>>) attributes {dimension_semantics = [#tpu.dimension_semantics<parallel>], iteration_bounds = array<i64: 1>, scalar_prefetch = 0 : i64, scratch_operands = 0 : i64, tpu.core_type = #tpu.core_type<tc>, window_params = [{transform_indices = @transform_0, window_bounds = array<i64: 64, 128>}, {transform_indices = @transform_1, window_bounds = array<i64: 64, 128>}, {pipeline_mode = #tpu.pipeline_mode<synchronous>, transform_indices = @transform_2, window_bounds = array<i64: 128, 128>}, {pipeline_mode = #tpu.pipeline_mode<synchronous>, transform_indices = @transform_3, window_bounds = array<i64: 1, 128>}, {pipeline_mode = #tpu.pipeline_mode<synchronous>, transform_indices = @transform_4, window_bounds = array<i64: 128, 256>}, {pipeline_mode = #tpu.pipeline_mode<synchronous>, transform_indices = @transform_5, window_bounds = array<i64: 1, 256>}, {pipeline_mode = #tpu.pipeline_mode<synchronous>, transform_indices = @transform_6, window_bounds = array<i64: 128, 128>}, {pipeline_mode = #tpu.pipeline_mode<synchronous>, transform_indices = @transform_7, window_bounds = array<i64: 1, 128>}, {pipeline_mode = #tpu.pipeline_mode<synchronous>, transform_indices = @transform_8, window_bounds = array<i64: 128, 128>}, {pipeline_mode = #tpu.pipeline_mode<synchronous>, transform_indices = @transform_9, window_bounds = array<i64: 1, 128>}, {transform_indices = @transform_10, window_bounds = array<i64: 64, 128>}, {transform_indices = @transform_11, window_bounds = array<i64: 64, 256>}]} {
    %c0 = arith.constant 0 : index
    %c0_0 = arith.constant 0 : index
    %0 = vector.load %arg1[%c0, %c0_0] : memref<64x128xf32, #tpu.memory_space<vmem>>, vector<64x128xf32>
    %c0_1 = arith.constant 0 : index
    %c0_2 = arith.constant 0 : index
    %1 = vector.load %arg3[%c0_1, %c0_2] : memref<128x128xf32, #tpu.memory_space<vmem>>, vector<128x128xf32>
    %cst = arith.constant dense<0.000000e+00> : vector<64x128xf32>
    %2 = tpu.matmul %0, %1, %cst {dimension_numbers = #tpu.dot_dimension_numbers<[1], [0], [0], [1], [0, 0, 1, 1], [], []>} : vector<64x128xf32>, vector<128x128xf32>, vector<64x128xf32> -> vector<64x128xf32>
    %c0_3 = arith.constant 0 : index
    %c0_4 = arith.constant 0 : index
    %3 = vector.load %arg4[%c0_3, %c0_4] : memref<1x128xf32, #tpu.memory_space<vmem>>, vector<1x128xf32>
    %4 = vector.broadcast %3 : vector<1x128xf32> to vector<64x128xf32>
    %5 = arith.addf %2, %4 : vector<64x128xf32>
    %cst_5 = arith.constant 0.000000e+00 : f32
    %6 = vector.broadcast %cst_5 : f32 to vector<64x128xf32>
    %7 = arith.maximumf %5, %6 : vector<64x128xf32>
    %c0_6 = arith.constant 0 : index
    %c0_7 = arith.constant 0 : index
    %8 = vector.load %arg5[%c0_6, %c0_7] : memref<128x256xf32, #tpu.memory_space<vmem>>, vector<128x256xf32>
    %cst_8 = arith.constant dense<0.000000e+00> : vector<64x256xf32>
    %9 = tpu.matmul %7, %8, %cst_8 {dimension_numbers = #tpu.dot_dimension_numbers<[1], [0], [0], [1], [0, 0, 1, 1], [], []>} : vector<64x128xf32>, vector<128x256xf32>, vector<64x256xf32> -> vector<64x256xf32>
    %c0_9 = arith.constant 0 : index
    %c0_10 = arith.constant 0 : index
    %10 = vector.load %arg6[%c0_9, %c0_10] : memref<1x256xf32, #tpu.memory_space<vmem>>, vector<1x256xf32>
    %11 = vector.broadcast %10 : vector<1x256xf32> to vector<64x256xf32>
    %12 = arith.addf %9, %11 : vector<64x256xf32>
    %13 = vector.extract_strided_slice %12 {offsets = [0, 0], sizes = [64, 128], strides = [1, 1]} : vector<64x256xf32> to vector<64x128xf32>
    %14 = vector.extract_strided_slice %12 {offsets = [0, 128], sizes = [64, 128], strides = [1, 1]} : vector<64x256xf32> to vector<64x128xf32>
    %cst_11 = arith.constant 5.000000e-01 : f32
    %15 = vector.broadcast %cst_11 : f32 to vector<64x128xf32>
    %16 = arith.mulf %15, %14 : vector<64x128xf32>
    %17 = math.exp %16 : vector<64x128xf32>
    %c0_12 = arith.constant 0 : index
    %c0_13 = arith.constant 0 : index
    %18 = vector.load %arg2[%c0_12, %c0_13] : memref<64x128xf32, #tpu.memory_space<vmem>>, vector<64x128xf32>
    %19 = arith.mulf %18, %17 : vector<64x128xf32>
    %20 = arith.addf %13, %19 : vector<64x128xf32>
    %c0_14 = arith.constant 0 : index
    %c0_15 = arith.constant 0 : index
    %21 = vector.load %arg7[%c0_14, %c0_15] : memref<128x128xf32, #tpu.memory_space<vmem>>, vector<128x128xf32>
    %cst_16 = arith.constant dense<0.000000e+00> : vector<64x128xf32>
    %22 = tpu.matmul %20, %21, %cst_16 {dimension_numbers = #tpu.dot_dimension_numbers<[1], [0], [0], [1], [0, 0, 1, 1], [], []>} : vector<64x128xf32>, vector<128x128xf32>, vector<64x128xf32> -> vector<64x128xf32>
    %c0_17 = arith.constant 0 : index
    %c0_18 = arith.constant 0 : index
    %23 = vector.load %arg8[%c0_17, %c0_18] : memref<1x128xf32, #tpu.memory_space<vmem>>, vector<1x128xf32>
    %24 = vector.broadcast %23 : vector<1x128xf32> to vector<64x128xf32>
    %25 = arith.addf %22, %24 : vector<64x128xf32>
    %cst_19 = arith.constant 0.000000e+00 : f32
    %26 = vector.broadcast %cst_19 : f32 to vector<64x128xf32>
    %27 = arith.maximumf %25, %26 : vector<64x128xf32>
    %c0_20 = arith.constant 0 : index
    %c0_21 = arith.constant 0 : index
    %28 = vector.load %arg9[%c0_20, %c0_21] : memref<128x128xf32, #tpu.memory_space<vmem>>, vector<128x128xf32>
    %cst_22 = arith.constant dense<0.000000e+00> : vector<64x128xf32>
    %29 = tpu.matmul %27, %28, %cst_22 {dimension_numbers = #tpu.dot_dimension_numbers<[1], [0], [0], [1], [0, 0, 1, 1], [], []>} : vector<64x128xf32>, vector<128x128xf32>, vector<64x128xf32> -> vector<64x128xf32>
    %c0_23 = arith.constant 0 : index
    %c0_24 = arith.constant 0 : index
    %30 = vector.load %arg10[%c0_23, %c0_24] : memref<1x128xf32, #tpu.memory_space<vmem>>, vector<1x128xf32>
    %31 = vector.broadcast %30 : vector<1x128xf32> to vector<64x128xf32>
    %32 = arith.addf %29, %31 : vector<64x128xf32>
    %33 = arith.negf %32 : vector<64x128xf32>
    %34 = math.exp %33 : vector<64x128xf32>
    %cst_25 = arith.constant 1.000000e+00 : f32
    %35 = vector.broadcast %cst_25 : f32 to vector<64x128xf32>
    %36 = arith.addf %35, %34 : vector<64x128xf32>
    %37 = arith.divf %35, %36 : vector<64x128xf32>
    %c0_26 = arith.constant 0 : index
    %c0_27 = arith.constant 0 : index
    %38 = vector.load %arg11[%c0_26, %c0_27] : memref<64x128xf32, #tpu.memory_space<vmem>>, vector<64x128xf32>
    tpu.vector_store %arg11[%c0_26, %c0_27], %37 {strides = array<i32>} : memref<64x128xf32, #tpu.memory_space<vmem>>, vector<64x128xf32>,
    %c0_28 = arith.constant 0 : index
    %c0_29 = arith.constant 0 : index
    %39 = vector.load %arg12[%c0_28, %c0_29] : memref<64x256xf32, #tpu.memory_space<vmem>>, vector<64x256xf32>
    tpu.vector_store %arg12[%c0_28, %c0_29], %12 {strides = array<i32>} : memref<64x256xf32, #tpu.memory_space<vmem>>, vector<64x256xf32>,
    return
  }
  func.func @transform_0(%arg0: i32) -> (i32, i32) {
    %c0_i32 = arith.constant 0 : i32
    %c0_i32_0 = arith.constant 0 : i32
    return %arg0, %c0_i32 : i32, i32
  }
  func.func @transform_1(%arg0: i32) -> (i32, i32) {
    %c0_i32 = arith.constant 0 : i32
    %c0_i32_0 = arith.constant 0 : i32
    return %arg0, %c0_i32 : i32, i32
  }
  func.func @transform_2(%arg0: i32) -> (i32, i32) {
    %c0_i32 = arith.constant 0 : i32
    %c0_i32_0 = arith.constant 0 : i32
    %c0_i32_1 = arith.constant 0 : i32
    return %c0_i32, %c0_i32_0 : i32, i32
  }
  func.func @transform_3(%arg0: i32) -> (i32, i32) {
    %c0_i32 = arith.constant 0 : i32
    %c0_i32_0 = arith.constant 0 : i32
    %c0_i32_1 = arith.constant 0 : i32
    return %c0_i32, %c0_i32_0 : i32, i32
  }
  func.func @transform_4(%arg0: i32) -> (i32, i32) {
    %c0_i32 = arith.constant 0 : i32
    %c0_i32_0 = arith.constant 0 : i32
    %c0_i32_1 = arith.constant 0 : i32
    return %c0_i32, %c0_i32_0 : i32, i32
  }
  func.func @transform_5(%arg0: i32) -> (i32, i32) {
    %c0_i32 = arith.constant 0 : i32
    %c0_i32_0 = arith.constant 0 : i32
    %c0_i32_1 = arith.constant 0 : i32
    return %c0_i32, %c0_i32_0 : i32, i32
  }
  func.func @transform_6(%arg0: i32) -> (i32, i32) {
    %c0_i32 = arith.constant 0 : i32
    %c0_i32_0 = arith.constant 0 : i32
    %c0_i32_1 = arith.constant 0 : i32
    return %c0_i32, %c0_i32_0 : i32, i32
  }
  func.func @transform_7(%arg0: i32) -> (i32, i32) {
    %c0_i32 = arith.constant 0 : i32
    %c0_i32_0 = arith.constant 0 : i32
    %c0_i32_1 = arith.constant 0 : i32
    return %c0_i32, %c0_i32_0 : i32, i32
  }
  func.func @transform_8(%arg0: i32) -> (i32, i32) {
    %c0_i32 = arith.constant 0 : i32
    %c0_i32_0 = arith.constant 0 : i32
    %c0_i32_1 = arith.constant 0 : i32
    return %c0_i32, %c0_i32_0 : i32, i32
  }
  func.func @transform_9(%arg0: i32) -> (i32, i32) {
    %c0_i32 = arith.constant 0 : i32
    %c0_i32_0 = arith.constant 0 : i32
    %c0_i32_1 = arith.constant 0 : i32
    return %c0_i32, %c0_i32_0 : i32, i32
  }
  func.func @transform_10(%arg0: i32) -> (i32, i32) {
    %c0_i32 = arith.constant 0 : i32
    %c0_i32_0 = arith.constant 0 : i32
    return %arg0, %c0_i32 : i32, i32
  }
  func.func @transform_11(%arg0: i32) -> (i32, i32) {
    %c0_i32 = arith.constant 0 : i32
    %c0_i32_0 = arith.constant 0 : i32
    return %arg0, %c0_i32 : i32, i32
  }
}

</mosaic_0001>

<bundles_post_ra>
// kernel: tpu_custom_call.1
= control target key start
LH: loop header
LB: loop body
LE: loop exit
PB: predicated region body
PF: predicated region fallthrough
CT: control target
= control target key end

     0   :  { %17 = vsyncpa [#allocation3], 0  ;;  %s1455_s0 = inlined_call_operand.hbm [shape: f32[64,128], index: 0, kind: input, shape index: {}]   ;;  %s1456_s1 = inlined_call_operand.hbm [shape: f32[64,128], index: 1, kind: input, shape index: {}]   ;;  %s1457_s2 = inlined_call_operand.hbm [shape: f32[128,128], index: 2, kind: input, shape index: {}]   ;;  %s1458_s3 = inlined_call_operand.vmem [shape: f32[1,128], index: 3, kind: input, shape index: {}]   ;;  %s1459_s4 = inlined_call_operand.hbm [shape: f32[128,256], index: 4, kind: input, shape index: {}]   ;;  %s1460_s5 = inlined_call_operand.vmem [shape: f32[1,256], index: 5, kind: input, shape index: {}]   ;;  %s1461_s6 = inlined_call_operand.hbm [shape: f32[128,128], index: 6, kind: input, shape index: {}]   ;;  %s1462_s7 = inlined_call_operand.vmem [shape: f32[1,128], index: 7, kind: input, shape index: {}]   ;;  %s1463_s8 = inlined_call_operand.hbm [shape: f32[128,128], index: 8, kind: input, shape index: {}]   ;;  %s1464_s9 = inlined_call_operand.vmem [shape: f32[1,128], index: 9, kind: input, shape index: {}]   ;;  %s1465_s10 = inlined_call_operand.hbm [shape: f32[64,128], index: 10, kind: output, shape index: {0}]   ;;  %s1466_s11 = inlined_call_operand.hbm [shape: f32[64,256], index: 11, kind: output, shape index: {1}]  }
   0x1   :  { %18 = vsyncpa [#allocation6], 0 }
   0x2   :  { %19 = vsyncpa [#allocation9], 0 }
   0x3   :  { %20 = vsyncpa [#allocation12], 0 }
   0x4   :  { %21 = vsyncpa [#allocation4], 0 }
   0x5   :  { %22 = vsyncpa [#allocation15], 0  ;;  %s1290_s17 = smov [#allocation5]   ;;  %s1291_s19 = smov [#allocation8]  }
   0x6   :  { %s40_s18 = sshll.u32 %s1290_s17, 4  ;;  %s66_s20 = sshll.u32 %s1291_s19, 4  ;;  %s41_s18 = int_to_ptr.vmem [resolvable:$true] %s40_s18  ;;  %s67_s20 = int_to_ptr.vmem [resolvable:$true] %s66_s20 }
   0x7   :  { %s1126_s21 = scalar_lea.vmem %s41_s18, 1024  ;;  %p1131_p1 = scmp.lt.s32.totalorder %s41_s18, %s41_s18 }
   0x8   :  { %p1127_p0 = scmp.ne.s32.totalorder %s41_s18, %s1126_s21  ;;  %p1132_p2 = scmp.lt.s32.totalorder %s1126_s21, %s1126_s21 }
   0xa   :  { %p1133_p3 = por %p1132_p2, %p1131_p1 }
   0xc   :  { %p1134_p4 = pnand %p1133_p3, %p1127_p0 }
   0xe   :  { %1137 = shalt.err (!%p1134_p4)
}
   0xf   :  { %s1292_s22 = smov 128   ;;  %s1293_s23 = smov 8  }
  0x10   :  { %46 = dma.hbm_to_vmem [thread:$0]  %s1456_s1, 1024, %s41_s18, [#allocation6], %s1292_s22, %s1292_s22, %s1293_s23  }
  0x11   :  { %s1146_s26 = scalar_lea.vmem %s67_s20, 4096  ;;  %p1151_p6 = scmp.lt.s32.totalorder %s67_s20, %s67_s20 }
  0x12   :  { %p1147_p5 = scmp.ne.s32.totalorder %s67_s20, %s1146_s26  ;;  %p1152_p7 = scmp.lt.s32.totalorder %s1146_s26, %s1146_s26 }
  0x14   :  { %p1153_p8 = por %p1152_p7, %p1151_p6 }
  0x16   :  { %p1154_p9 = pnand %p1153_p8, %p1147_p5 }
  0x18   :  { %1157 = shalt.err (!%p1154_p9)
}
  0x19   :  { %s1294_s27 = smov 256   ;;  %s1295_s28 = smov 16  }
  0x1a   :  { %72 = dma.hbm_to_vmem [thread:$0]  %s1459_s4, 4096, %s67_s20, [#allocation9], %s1294_s27, %s1294_s27, %s1295_s28  }
  0x1b   :  { %s1296_s12 = smov [#allocation2]   ;;  %s1297_s14 = smov [#allocation7]  }
  0x1c   :  { %s28_s13 = sshll.u32 %s1296_s12, 4  ;;  %s52_s1 = sshll.u32 %s1297_s14, 4  ;;  %s29_s13 = int_to_ptr.vmem [resolvable:$true] %s28_s13  ;;  %s53_s1 = int_to_ptr.vmem [resolvable:$true] %s52_s1 }
  0x1d   :  { %s1166_s15 = scalar_lea.vmem %s29_s13, 1024  ;;  %p1171_p11 = scmp.lt.s32.totalorder %s29_s13, %s29_s13 }
  0x1e   :  { %p1167_p10 = scmp.ne.s32.totalorder %s29_s13, %s1166_s15  ;;  %p1172_p12 = scmp.lt.s32.totalorder %s1166_s15, %s1166_s15 }
  0x20   :  { %p1173_p13 = por %p1172_p12, %p1171_p11 }
  0x22   :  { %p1174_p0 = pnand %p1173_p13, %p1167_p10 }
  0x24   :  { %1177 = shalt.err (!%p1174_p0)
}
  0x25   :  { %34 = dma.hbm_to_vmem [thread:$0]  %s1455_s0, 1024, %s29_s13, [#allocation3], %s1292_s22, %s1292_s22, %s1293_s23  }
  0x26   :  { %s1186_s4 = scalar_lea.vmem %s53_s1, 2048  ;;  %p1191_p2 = scmp.lt.s32.totalorder %s53_s1, %s53_s1 }
  0x27   :  { %p1187_p1 = scmp.ne.s32.totalorder %s53_s1, %s1186_s4  ;;  %p1192_p3 = scmp.lt.s32.totalorder %s1186_s4, %s1186_s4 }
  0x29   :  { %p1193_p4 = por %p1192_p3, %p1191_p2 }
  0x2b   :  { %p1194_p5 = pnand %p1193_p4, %p1187_p1 }
  0x2d   :  { %1197 = shalt.err (!%p1194_p5)
}
  0x2e   :  { %58 = dma.hbm_to_vmem [thread:$0]  %s1457_s2, 2048, %s53_s1, [#allocation6], %s1292_s22, %s1292_s22, %s1293_s23  }
  0x2f   :  { %s1298_s20 = smov [#allocation10]   ;;  %s1299_s24 = smov [#allocation11]  }
  0x30   :  { %s80_s21 = sshll.u32 %s1298_s20, 4  ;;  %s94_s25 = sshll.u32 %s1299_s24, 4  ;;  %s81_s21 = int_to_ptr.vmem [resolvable:$true] %s80_s21  ;;  %s95_s25 = int_to_ptr.vmem [resolvable:$true] %s94_s25 }
  0x31   :  { %s1206_s0 = scalar_lea.vmem %s81_s21, 2048  ;;  %p1211_p7 = scmp.lt.s32.totalorder %s81_s21, %s81_s21 }
  0x32   :  { %p1207_p6 = scmp.ne.s32.totalorder %s81_s21, %s1206_s0  ;;  %p1212_p8 = scmp.lt.s32.totalorder %s1206_s0, %s1206_s0 }
  0x34   :  { %p1213_p9 = por %p1212_p8, %p1211_p7 }
  0x36   :  { %p1214_p10 = pnand %p1213_p9, %p1207_p6 }
  0x38   :  { %1217 = shalt.err (!%p1214_p10)
}
  0x39   :  { %86 = dma.hbm_to_vmem [thread:$0]  %s1461_s6, 2048, %s81_s21, [#allocation9], %s1292_s22, %s1292_s22, %s1293_s23  }
  0x3a   :  { %s1226_s2 = scalar_lea.vmem %s95_s25, 2048  ;;  %p1231_p12 = scmp.lt.s32.totalorder %s95_s25, %s95_s25 }
  0x3b   :  { %p1227_p11 = scmp.ne.s32.totalorder %s95_s25, %s1226_s2  ;;  %p1232_p13 = scmp.lt.s32.totalorder %s1226_s2, %s1226_s2 }
  0x3d   :  { %p1233_p0 = por %p1232_p13, %p1231_p12 }
  0x3f   :  { %p1234_p1 = pnand %p1233_p0, %p1227_p11 }
  0x41   :  { %1237 = shalt.err (!%p1234_p1)
}
  0x42   :  { %100 = dma.hbm_to_vmem [thread:$0]  %s1463_s8, 2048, %s95_s25, [#allocation12], %s1292_s22, %s1292_s22, %s1293_s23  }
  0x43   :  { %1278 = dma.done.wait [#allocation3], 1024  }
  0x44   :  { %1279 = vsyncadd [#allocation3], 4294966272 }
  0x45   :  { %1280 = dma.done.wait [#allocation6], 3072  }
  0x46   :  { %1281 = vsyncadd [#allocation6], 4294964224 }
  0x47   :  { %1282 = dma.done.wait [#allocation9], 6144  }
  0x48   :  { %1283 = vsyncadd [#allocation9], 4294961152 }
  0x49   :  { %1284 = dma.done.wait [#allocation12], 2048  }
  0x4a   :  { %1285 = vsyncadd [#allocation12], 4294965248  ;;  %v144_v0 = vld [vmem:[#allocation7 + $0x78] sm:$0xff]  ;;  %v143_v1 = vld [vmem:[#allocation7 + $0x70] sm:$0xff]  ;;  %v1300_v56 = vmov 0.0  }
  0x4b   :  { %925 = vmatprep.subr.mxu0 %v144_v0  ;;  %v142_v2 = vld [vmem:[#allocation7 + $0x68] sm:$0xff]  ;;  %v141_v3 = vld [vmem:[#allocation7 + $0x60] sm:$0xff]  ;;  %v140_v5 = vld [vmem:[#allocation7 + $0x58] sm:$0xff]  ;;  %373 = vmatprep.mubr.f32.mxu1 %v1300_v56 }
  0x4c   :  { %926 = vmatpush3.msra.mxu0 %v144_v0  ;;  %v121_v4 = vld [vmem:[#allocation2] sm:$0xff]  ;;  %v139_v6 = vld [vmem:[#allocation7 + $0x50] sm:$0xff]  ;;  %v296_v7 = vld [vmem:[#allocation8 + $0xf8] sm:$0xff] }
  0x4d   :  { %927 = vmatprep.subr.mxu0 %v143_v1  ;;  %957 = vmatprep.mubr.f32.mxu0 %v121_v4  ;;  %v295_v8 = vld [vmem:[#allocation8 + $0xf0] sm:$0xff]  ;;  %v294_v9 = vld [vmem:[#allocation8 + $0xe8] sm:$0xff]  ;;  %v293_v10 = vld [vmem:[#allocation8 + $0xe0] sm:$0xff] }
  0x4e   :  { %928 = vmatpush3.msra.mxu0 %v143_v1  ;;  %309 = vmatprep.subr.mxu1 %v296_v7  ;;  %v138_v11 = vld [vmem:[#allocation7 + $0x48] sm:$0xff]  ;;  %v292_v12 = vld [vmem:[#allocation8 + $0xd8] sm:$0xff]  ;;  %v291_v13 = vld [vmem:[#allocation8 + $0xd0] sm:$0xff] }
  0x4f   :  { %929 = vmatprep.subr.mxu0 %v142_v2  ;;  %310 = vmatpush1.msra.mxu1 %v295_v8  ;;  %v137_v14 = vld [vmem:[#allocation7 + $0x40] sm:$0xff]  ;;  %v290_v15 = vld [vmem:[#allocation8 + $0xc8] sm:$0xff]  ;;  %v136_v17 = vld [vmem:[#allocation7 + $0x38] sm:$0xff] }
  0x50   :  { %930 = vmatpush3.msra.mxu0 %v142_v2  ;;  %311 = vmatprep.subr.mxu1 %v294_v9  ;;  %v289_v16 = vld [vmem:[#allocation8 + $0xc0] sm:$0xff]  ;;  %v288_v18 = vld [vmem:[#allocation8 + $0xb8] sm:$0xff]  ;;  %v287_v19 = vld [vmem:[#allocation8 + $0xb0] sm:$0xff] }
  0x51   :  { %931 = vmatprep.subr.mxu0 %v141_v3  ;;  %312 = vmatpush1.msra.mxu1 %v293_v10  ;;  %v135_v20 = vld [vmem:[#allocation7 + $0x30] sm:$0xff]  ;;  %v286_v21 = vld [vmem:[#allocation8 + $0xa8] sm:$0xff]  ;;  %v285_v22 = vld [vmem:[#allocation8 + $0xa0] sm:$0xff] }
  0x52   :  { %932 = vmatpush3.msra.mxu0 %v141_v3  ;;  %313 = vmatprep.subr.mxu1 %v292_v12  ;;  %v134_v23 = vld [vmem:[#allocation7 + $0x28] sm:$0xff]  ;;  %v284_v24 = vld [vmem:[#allocation8 + $0x98] sm:$0xff]  ;;  %v283_v25 = vld [vmem:[#allocation8 + $0x90] sm:$0xff] }
  0x53   :  { %933 = vmatprep.subr.mxu0 %v140_v5  ;;  %314 = vmatpush1.msra.mxu1 %v291_v13  ;;  %v133_v26 = vld [vmem:[#allocation7 + $0x20] sm:$0xff]  ;;  %v282_v27 = vld [vmem:[#allocation8 + $0x88] sm:$0xff]  ;;  %v132_v29 = vld [vmem:[#allocation7 + $0x18] sm:$0xff] }
  0x54   :  { %934 = vmatpush3.msra.mxu0 %v140_v5  ;;  %315 = vmatprep.subr.mxu1 %v290_v15  ;;  %v281_v28 = vld [vmem:[#allocation8 + $0x80] sm:$0xff]  ;;  %v280_v30 = vld [vmem:[#allocation8 + $0x78] sm:$0xff]  ;;  %v279_v31 = vld [vmem:[#allocation8 + $0x70] sm:$0xff] }
  0x55   :  { %935 = vmatprep.subr.mxu0 %v139_v6  ;;  %316 = vmatpush1.msra.mxu1 %v289_v16  ;;  %v131_v32 = vld [vmem:[#allocation7 + $0x10] sm:$0xff]  ;;  %v278_v33 = vld [vmem:[#allocation8 + $0x68] sm:$0xff]  ;;  %v277_v34 = vld [vmem:[#allocation8 + $0x60] sm:$0xff] }
  0x56   :  { %936 = vmatpush3.msra.mxu0 %v139_v6  ;;  %317 = vmatprep.subr.mxu1 %v288_v18  ;;  %v130_v35 = vld [vmem:[#allocation7 + $0x8] sm:$0xff]  ;;  %v276_v36 = vld [vmem:[#allocation8 + $0x58] sm:$0xff]  ;;  %v275_v37 = vld [vmem:[#allocation8 + $0x50] sm:$0xff] }
  0x57   :  { %937 = vmatprep.subr.mxu0 %v138_v11  ;;  %318 = vmatpush1.msra.mxu1 %v287_v19  ;;  %v129_v38 = vld [vmem:[#allocation7] sm:$0xff]  ;;  %v274_v39 = vld [vmem:[#allocation8 + $0x48] sm:$0xff]  ;;  %v272_v42 = vld [vmem:[#allocation8 + $0x38] sm:$0xff] }
  0x58   :  { %938 = vmatpush3.msra.mxu0 %v138_v11  ;;  %319 = vmatprep.subr.mxu1 %v286_v21  ;;  %v273_v40 = vld [vmem:[#allocation8 + $0x40] sm:$0xff]  ;;  %v122_v41 = vld [vmem:[#allocation2 + $0x8] sm:$0xff]  ;;  %v123_v43 = vld [vmem:[#allocation2 + $0x10] sm:$0xff] }
  0x59   :  { %939 = vmatprep.subr.mxu0 %v137_v14  ;;  %320 = vmatpush1.msra.mxu1 %v285_v22  ;;  %v124_v44 = vld [vmem:[#allocation2 + $0x18] sm:$0xff]  ;;  %v125_v45 = vld [vmem:[#allocation2 + $0x20] sm:$0xff]  ;;  %v126_v46 = vld [vmem:[#allocation2 + $0x28] sm:$0xff] }
  0x5a   :  { %940 = vmatpush3.msra.mxu0 %v137_v14  ;;  %321 = vmatprep.subr.mxu1 %v284_v24  ;;  %v127_v47 = vld [vmem:[#allocation2 + $0x30] sm:$0xff]  ;;  %v128_v48 = vld [vmem:[#allocation2 + $0x38] sm:$0xff]  ;;  %v270_v50 = vld [vmem:[#allocation8 + $0x28] sm:$0xff] }
  0x5b   :  { %941 = vmatprep.subr.mxu0 %v136_v17  ;;  %322 = vmatpush1.msra.mxu1 %v283_v25  ;;  %v271_v49 = vld [vmem:[#allocation8 + $0x30] sm:$0xff]  ;;  %v269_v51 = vld [vmem:[#allocation8 + $0x20] sm:$0xff]  ;;  %v268_v52 = vld [vmem:[#allocation8 + $0x18] sm:$0xff] }
  0x5c   :  { %942 = vmatpush3.msra.mxu0 %v136_v17  ;;  %323 = vmatprep.subr.mxu1 %v282_v27  ;;  %v267_v53 = vld [vmem:[#allocation8 + $0x10] sm:$0xff]  ;;  %v266_v54 = vld [vmem:[#allocation8 + $0x8] sm:$0xff]  ;;  %v265_v55 = vld [vmem:[#allocation8] sm:$0xff] }
  0x5d   :  { %943 = vmatprep.subr.mxu0 %v135_v20  ;;  %324 = vmatpush1.msra.mxu1 %v281_v28  ;;  %v485_v57 = vld [vmem:[#allocation10 + $0x78] sm:$0xff]  ;;  %v842_v59 = vld [vmem:[%s1458_s3] ss:$0 sm:$0xff]  ;;  %v484_v19 = vld [vmem:[#allocation10 + $0x70] sm:$0xff] }
  0x5e   :  { %944 = vmatpush3.msra.mxu0 %v135_v20  ;;  %325 = vmatprep.subr.mxu1 %v280_v30  ;;  %v483_v20 = vld [vmem:[#allocation10 + $0x68] sm:$0xff]  ;;  %v482_v21 = vld [vmem:[#allocation10 + $0x60] sm:$0xff]  ;;  %v481_v22 = vld [vmem:[#allocation10 + $0x58] sm:$0xff] }
  0x5f   :  { %945 = vmatprep.subr.mxu0 %v134_v23  ;;  %326 = vmatpush1.msra.mxu1 %v279_v31  ;;  %v479_v24 = vld [vmem:[#allocation10 + $0x48] sm:$0xff]  ;;  %v478_v25 = vld [vmem:[#allocation10 + $0x40] sm:$0xff]  ;;  %v476_v27 = vld [vmem:[#allocation10 + $0x30] sm:$0xff] }
  0x60   :  { %946 = vmatpush3.msra.mxu0 %v134_v23  ;;  %327 = vmatprep.subr.mxu1 %v278_v33  ;;  %v480_v23 = vld [vmem:[#allocation10 + $0x50] sm:$0xff]  ;;  %v475_v28 = vld [vmem:[#allocation10 + $0x28] sm:$0xff]  ;;  %v473_v30 = vld [vmem:[#allocation10 + $0x18] sm:$0xff] }
  0x61   :  { %947 = vmatprep.subr.mxu0 %v133_v26  ;;  %328 = vmatpush1.msra.mxu1 %v277_v34  ;;  %v472_v31 = vld [vmem:[#allocation10 + $0x10] sm:$0xff]  ;;  %v470_v33 = vld [vmem:[#allocation10] sm:$0xff]  ;;  %v621_v34 = vld [vmem:[#allocation11 + $0x78] sm:$0xff] }
  0x62   :  { %948 = vmatpush3.msra.mxu0 %v133_v26  ;;  %329 = vmatprep.subr.mxu1 %v276_v36  ;;  %v477_v26 = vld [vmem:[#allocation10 + $0x38] sm:$0xff]  ;;  %v619_v36 = vld [vmem:[#allocation11 + $0x68] sm:$0xff] }
  0x63   :  { %949 = vmatprep.subr.mxu0 %v132_v29  ;;  %330 = vmatpush1.msra.mxu1 %v275_v37  ;;  %v618_v37 = vld [vmem:[#allocation11 + $0x60] sm:$0xff] }
  0x64   :  { %950 = vmatpush3.msra.mxu0 %v132_v29  ;;  %331 = vmatprep.subr.mxu1 %v274_v39  ;;  %v474_v29 = vld [vmem:[#allocation10 + $0x20] sm:$0xff]  ;;  %v616_v39 = vld [vmem:[#allocation11 + $0x50] sm:$0xff] }
  0x65   :  { %951 = vmatprep.subr.mxu0 %v131_v32  ;;  %332 = vmatpush1.msra.mxu1 %v273_v40  ;;  %v615_v40 = vld [vmem:[#allocation11 + $0x48] sm:$0xff] }
  0x66   :  { %952 = vmatpush3.msra.mxu0 %v131_v32  ;;  %333 = vmatprep.subr.mxu1 %v272_v42  ;;  %v471_v32 = vld [vmem:[#allocation10 + $0x8] sm:$0xff]  ;;  %v613_v42 = vld [vmem:[#allocation11 + $0x38] sm:$0xff] }
  0x67   :  { %953 = vmatprep.subr.mxu0 %v130_v35  ;;  %334 = vmatpush1.msra.mxu1 %v271_v49  ;;  %v297_v49 = vld [vmem:[%s1460_s5] sm:$0x3] }
  0x68   :  { %954 = vmatpush3.msra.mxu0 %v130_v35  ;;  %335 = vmatprep.subr.mxu1 %v270_v50  ;;  %v620_v35 = vld [vmem:[#allocation11 + $0x70] sm:$0xff] }
  0x69   :  { %955 = vmatprep.subr.mxu0 %v129_v38  ;;  %336 = vmatpush1.msra.mxu1 %v269_v51 }
  0x6a   :  { %956 = vmatpush3.msra.mxu0 %v129_v38  ;;  %337 = vmatprep.subr.mxu1 %v268_v52  ;;  %v617_v38 = vld [vmem:[#allocation11 + $0x58] sm:$0xff] }
  0x6b   :  { %958 = vmatmul.mubr.f32.vlgmr.msra.gmra.mxu0 %v122_v41  ;;  %338 = vmatpush1.msra.mxu1 %v267_v53  ;;  %v614_v41 = vld [vmem:[#allocation11 + $0x40] sm:$0xff] }
  0x6c   :  { %960 = vmatprep.mubr.f32.mxu0 %v123_v43  ;;  %339 = vmatprep.subr.mxu1 %v266_v54  ;;  %v612_v43 = vld [vmem:[#allocation11 + $0x30] sm:$0xff] }
  0x6d   :  { %340 = vmatpush1.msra.mxu1 %v265_v55  ;;  %969 = vmatprep.subr.mxu0 %v485_v57 }
  0x6e   :  { %970 = vmatpush3.msra.mxu0 %v485_v57  ;;  %1013 = vmatprep.subr.mxu1 %v621_v34 }
  0x6f   :  { %961 = vmatmul.mubr.f32.gmra.mxu0 %v124_v44  ;;  %971 = vmatprep.subr.mxu0 %v484_v19  ;;  %v611_v44 = vld [vmem:[#allocation11 + $0x28] sm:$0xff] }
  0x70   :  { %963 = vmatprep.mubr.f32.mxu0 %v125_v45  ;;  %972 = vmatpush3.msra.mxu0 %v484_v19  ;;  %v610_v45 = vld [vmem:[#allocation11 + $0x20] sm:$0xff] }
  0x71   :  { %973 = vmatprep.subr.mxu0 %v483_v20 }
  0x72   :  { %974 = vmatpush3.msra.mxu0 %v483_v20 }
  0x73   :  { %964 = vmatmul.mubr.f32.gmra.mxu0 %v126_v46  ;;  %975 = vmatprep.subr.mxu0 %v482_v21  ;;  %v299_v46 = vlaneseq }
  0x74   :  { %966 = vmatprep.mubr.f32.mxu0 %v127_v47  ;;  %976 = vmatpush3.msra.mxu0 %v482_v21 }
  0x75   :  { %977 = vmatprep.subr.mxu0 %v481_v22  ;;  %v300_v47 = vshrl.u32 %v299_v46, 7  ;;  %v449_v46 = vld [vmem:[#allocation5 + $0x18] sm:$0xff] }
  0x76   :  { %978 = vmatpush3.msra.mxu0 %v481_v22 }
  0x77   :  { %967 = vmatmul.mubr.f32.gmra.mxu0 %v128_v48  ;;  %979 = vmatprep.subr.mxu0 %v480_v23  ;;  %v301_v48 = vsub.s32 0, %v300_v47  ;;  %v305_v50 = vsub.s32 1, %v300_v47 }
  0x78   :  { %980 = vmatpush3.msra.mxu0 %v480_v23 }
  0x79   :  { %981 = vmatprep.subr.mxu0 %v479_v24  ;;  %v1405_v51 = vrot.slane %v297_v49, %v301_v48  ;;  %v1407_v52 = vrot.slane %v297_v49, %v305_v50 }
  0x7a   :  { %982 = vmatpush3.msra.mxu0 %v479_v24 }
  0x7b   :  { %983 = vmatprep.subr.mxu0 %v478_v25 }
  0x7c   :  { %984 = vmatpush3.msra.mxu0 %v478_v25 }
  0x7d   :  { %985 = vmatprep.subr.mxu0 %v477_v26 }
  0x7e   :  { %986 = vmatpush3.msra.mxu0 %v477_v26 }
  0x7f   :  { %987 = vmatprep.subr.mxu0 %v476_v27 }
  0x80   :  { %988 = vmatpush3.msra.mxu0 %v476_v27  ;;  %v447_v27 = vld [vmem:[#allocation5 + $0x8] sm:$0xff] }
  0x81   :  { %989 = vmatprep.subr.mxu0 %v475_v28 }
  0x82   :  { %990 = vmatpush3.msra.mxu0 %v475_v28 }
  0x83   :  { %991 = vmatprep.subr.mxu0 %v474_v29 }
  0x84   :  { %992 = vmatpush3.msra.mxu0 %v474_v29 }
  0x85   :  { %993 = vmatprep.subr.mxu0 %v473_v30 }
  0x86   :  { %994 = vmatpush3.msra.mxu0 %v473_v30 }
  0x87   :  { %995 = vmatprep.subr.mxu0 %v472_v31 }
  0x88   :  { %996 = vmatpush3.msra.mxu0 %v472_v31 }
  0x89   :  { %997 = vmatprep.subr.mxu0 %v471_v32 }
  0x8a   :  { %998 = vmatpush3.msra.mxu0 %v471_v32 }
  0x8b   :  { %999 = vmatprep.subr.mxu0 %v470_v33 }
  0x8c   :  { %1000 = vmatpush3.msra.mxu0 %v470_v33 }
 0x12b   :  { %v959_v58 = vpop.f32.mrf.mxu0 }
 0x12c   :  { %v224_v63 = vadd.f32 %v959_v58, %v842_v59 }
 0x12d   :  { %v218_v60 = vpop.f32.mrf.mxu0 }
 0x12e   :  { %v219_v61 = vadd.f32 %v842_v59, %v218_v60  ;;  %v258_v2 = vmax.f32 %v224_v63, 0.0 }
 0x12f   :  { %v962_v62 = vpop.f32.mrf.mxu0 }
 0x130   :  { %v257_v0 = vmax.f32 %v219_v61, 0.0  ;;  %v234_v5 = vadd.f32 %v962_v62, %v842_v59 }
 0x131   :  { %v228_v1 = vpop.f32.mrf.mxu0 }
 0x132   :  { %374 = vmatmul.mubr.f32.vlgmr.msra.gmra.mxu1 %v257_v0  ;;  %v229_v3 = vadd.f32 %v842_v59, %v228_v1  ;;  %v260_v8 = vmax.f32 %v234_v5, 0.0 }
 0x133   :  { %379 = vmatprep.mubr.f32.mxu1 %v1300_v56  ;;  %v965_v4 = vpop.f32.mrf.mxu0  ;;  %1014 = vmatpush3.msra.mxu1 %v621_v34 }
 0x134   :  { %v259_v6 = vmax.f32 %v229_v3, 0.0  ;;  %v244_v11 = vadd.f32 %v965_v4, %v842_v59  ;;  %1015 = vmatprep.subr.mxu1 %v620_v35 }
 0x135   :  { %v238_v7 = vpop.f32.mrf.mxu0  ;;  %1016 = vmatpush3.msra.mxu1 %v620_v35 }
 0x136   :  { %380 = vmatmul.mubr.f32.gmra.mxu1 %v258_v2  ;;  %v239_v9 = vadd.f32 %v842_v59, %v238_v7  ;;  %v262_v14 = vmax.f32 %v244_v11, 0.0  ;;  %1017 = vmatprep.subr.mxu1 %v619_v36 }
 0x137   :  { %385 = vmatprep.mubr.f32.mxu1 %v1300_v56  ;;  %v968_v10 = vpop.f32.mrf.mxu0  ;;  %1018 = vmatpush3.msra.mxu1 %v619_v36 }
 0x138   :  { %v261_v12 = vmax.f32 %v239_v9, 0.0  ;;  %v254_v16 = vadd.f32 %v968_v10, %v842_v59  ;;  %1019 = vmatprep.subr.mxu1 %v618_v37 }
 0x139   :  { %v248_v13 = vpop.f32.mrf.mxu0  ;;  %1020 = vmatpush3.msra.mxu1 %v618_v37  ;;  %v448_v37 = vld [vmem:[#allocation5 + $0x10] sm:$0xff] }
 0x13a   :  { %386 = vmatmul.mubr.f32.gmra.mxu1 %v259_v6  ;;  %v249_v15 = vadd.f32 %v842_v59, %v248_v13  ;;  %v264_v18 = vmax.f32 %v254_v16, 0.0  ;;  %1021 = vmatprep.subr.mxu1 %v617_v38 }
 0x13b   :  { %391 = vmatprep.mubr.f32.mxu1 %v1300_v56  ;;  %1022 = vmatpush3.msra.mxu1 %v617_v38 }
 0x13c   :  { %v263_v17 = vmax.f32 %v249_v15, 0.0  ;;  %1023 = vmatprep.subr.mxu1 %v616_v39 }
 0x13d   :  { %1024 = vmatpush3.msra.mxu1 %v616_v39 }
 0x13e   :  { %392 = vmatmul.mubr.f32.gmra.mxu1 %v260_v8  ;;  %1025 = vmatprep.subr.mxu1 %v615_v40 }
 0x13f   :  { %397 = vmatprep.mubr.f32.mxu1 %v1300_v56  ;;  %1026 = vmatpush3.msra.mxu1 %v615_v40 }
 0x140   :  { %1027 = vmatprep.subr.mxu1 %v614_v41 }
 0x141   :  { %1028 = vmatpush3.msra.mxu1 %v614_v41 }
 0x142   :  { %398 = vmatmul.mubr.f32.gmra.mxu1 %v261_v12  ;;  %1029 = vmatprep.subr.mxu1 %v613_v42 }
 0x143   :  { %403 = vmatprep.mubr.f32.mxu1 %v1300_v56  ;;  %1030 = vmatpush3.msra.mxu1 %v613_v42 }
 0x144   :  { %1031 = vmatprep.subr.mxu1 %v612_v43 }
 0x145   :  { %1032 = vmatpush3.msra.mxu1 %v612_v43 }
 0x146   :  { %404 = vmatmul.mubr.f32.gmra.mxu1 %v262_v14  ;;  %1033 = vmatprep.subr.mxu1 %v611_v44 }
 0x147   :  { %409 = vmatprep.mubr.f32.mxu1 %v1300_v56  ;;  %1034 = vmatpush3.msra.mxu1 %v611_v44 }
 0x148   :  { %1035 = vmatprep.subr.mxu1 %v610_v45 }
 0x149   :  { %1036 = vmatpush3.msra.mxu1 %v610_v45 }
 0x14a   :  { %410 = vmatmul.mubr.f32.gmra.mxu1 %v263_v17 }
 0x14b   :  { %415 = vmatprep.mubr.f32.mxu1 %v1300_v56 }
 0x14e   :  { %416 = vmatmul.mubr.f32.gmra.mxu1 %v264_v18  ;;  %v446_v18 = vld [vmem:[#allocation5] sm:$0xff] }
 0x1f2   :  { %v375_v53 = vpop.f32.mrf.mxu1 }
 0x1f3   :  { %v376_v54 = vadd.f32 %v375_v53, %v1405_v51  ;;  %v450_v53 = vld [vmem:[#allocation5 + $0x20] sm:$0xff] }
 0x1f4   :  { %v377_v55 = vpop.f32.mrf.mxu1 }
 0x1f5   :  { %790 = vst [vmem:[#allocation14] sm:$0xff] %v376_v54  ;;  %v378_v56 = vadd.f32 %v377_v55, %v1407_v52 }
 0x1f6   :  { %v381_v57 = vpop.f32.mrf.mxu1 }
 0x1f7   :  { %v422_v58 = vmul.f32 0.5, %v378_v56  ;;  %791 = vst [vmem:[#allocation14 + $0x8] sm:$0xff] %v378_v56  ;;  %v1412_v59 = vadd.f32 %v381_v57, %v1405_v51 }
 0x1f8   :  { %v383_v60 = vpop.f32.mrf.mxu1 }
 0x1f9   :  { %v430_v61 = vmul.f32 1.442695, %v422_v58  ;;  %792 = vst [vmem:[#allocation14 + $0x10] sm:$0xff] %v1412_v59  ;;  %v384_v62 = vadd.f32 %v383_v60, %v1407_v52  ;;  %v452_v60 = vld [vmem:[#allocation5 + $0x30] sm:$0xff] }
 0x1fa   :  { %v387_v63 = vpop.f32.mrf.mxu1 }
 0x1fb   :  { %1070 = vpow2.f32 %v430_v61  ;;  %v423_v0 = vmul.f32 0.5, %v384_v62  ;;  %793 = vst [vmem:[#allocation14 + $0x18] sm:$0xff] %v384_v62  ;;  %v1417_v1 = vadd.f32 %v387_v63, %v1405_v51 }
 0x1fc   :  { %v389_v2 = vpop.f32.mrf.mxu1 }
 0x1fd   :  { %v432_v3 = vmul.f32 1.442695, %v423_v0  ;;  %794 = vst [vmem:[#allocation14 + $0x20] sm:$0xff] %v1417_v1  ;;  %v390_v4 = vadd.f32 %v389_v2, %v1407_v52  ;;  %v453_v0 = vld [vmem:[#allocation5 + $0x38] sm:$0xff] }
 0x1fe   :  { %v393_v5 = vpop.f32.mrf.mxu1 }
 0x1ff   :  { %1072 = vpow2.f32 %v432_v3  ;;  %v424_v6 = vmul.f32 0.5, %v390_v4  ;;  %795 = vst [vmem:[#allocation14 + $0x28] sm:$0xff] %v390_v4  ;;  %v1422_v7 = vadd.f32 %v393_v5, %v1405_v51  ;;  %v609_v5 = vld [vmem:[#allocation11 + $0x18] sm:$0xff] }
 0x200   :  { %v395_v8 = vpop.f32.mrf.mxu1  ;;  %1037 = vmatprep.subr.mxu1 %v609_v5 }
 0x201   :  { %v434_v9 = vmul.f32 1.442695, %v424_v6  ;;  %796 = vst [vmem:[#allocation14 + $0x30] sm:$0xff] %v1422_v7  ;;  %v396_v10 = vadd.f32 %v395_v8, %v1407_v52  ;;  %1038 = vmatpush3.msra.mxu1 %v609_v5  ;;  %v608_v6 = vld [vmem:[#allocation11 + $0x10] sm:$0xff]  ;;  %v606_v8 = vld [vmem:[#allocation11] sm:$0xff] }
 0x202   :  { %v399_v11 = vpop.f32.mrf.mxu1  ;;  %1039 = vmatprep.subr.mxu1 %v608_v6 }
 0x203   :  { %1074 = vpow2.f32 %v434_v9  ;;  %v425_v12 = vmul.f32 0.5, %v396_v10  ;;  %797 = vst [vmem:[#allocation14 + $0x38] sm:$0xff] %v396_v10  ;;  %v400_v13 = vadd.f32 %v399_v11, %v1405_v51  ;;  %1040 = vmatpush3.msra.mxu1 %v608_v6  ;;  %v843_v9 = vld [vmem:[%s1462_s7] ss:$0 sm:$0xff]  ;;  %s1301_s7 = smov [#allocation14]  }
 0x204   :  { %v401_v14 = vpop.f32.mrf.mxu1  ;;  %s823_s1 = sshll.u32 %s1301_s7, 4  ;;  %s824_s1 = int_to_ptr.vmem [resolvable:$true] %s823_s1 }
 0x205   :  { %v436_v15 = vmul.f32 1.442695, %v425_v12  ;;  %798 = vst [vmem:[#allocation14 + $0x40] sm:$0xff] %v400_v13  ;;  %v402_v16 = vadd.f32 %v401_v14, %v1407_v52  ;;  %s1238_s15 = scalar_lea.vmem %s824_s1, 2048  ;;  %p1243_p3 = scmp.lt.s32.totalorder %s824_s1, %s824_s1 }
 0x206   :  { %v405_v17 = vpop.f32.mrf.mxu1  ;;  %p1239_p2 = scmp.ne.s32.totalorder %s824_s1, %s1238_s15  ;;  %p1244_p4 = scmp.lt.s32.totalorder %s1238_s15, %s1238_s15 }
 0x207   :  { %1076 = vpow2.f32 %v436_v15  ;;  %v426_v19 = vmul.f32 0.5, %v402_v16  ;;  %799 = vst [vmem:[#allocation14 + $0x48] sm:$0xff] %v402_v16  ;;  %v406_v20 = vadd.f32 %v405_v17, %v1405_v51 }
 0x208   :  { %v1071_v21 = vpop.eup %1070  ;;  %v407_v22 = vpop.f32.mrf.mxu1  ;;  %p1245_p5 = por %p1244_p4, %p1243_p3 }
 0x209   :  { %v438_v23 = vmul.f32 1.442695, %v426_v19  ;;  %800 = vst [vmem:[#allocation14 + $0x50] sm:$0xff] %v406_v20  ;;  %v408_v24 = vadd.f32 %v407_v22, %v1407_v52  ;;  %v454_v25 = vmul.f32 %v1071_v21, %v446_v18 }
 0x20a   :  { %v411_v26 = vpop.f32.mrf.mxu1  ;;  %p1246_p6 = pnand %p1245_p5, %p1239_p2 }
 0x20b   :  { %1078 = vpow2.f32 %v438_v23  ;;  %v427_v28 = vmul.f32 0.5, %v408_v24  ;;  %801 = vst [vmem:[#allocation14 + $0x58] sm:$0xff] %v408_v24  ;;  %v412_v29 = vadd.f32 %v411_v26, %v1405_v51  ;;  %v462_v30 = vadd.f32 %v454_v25, %v376_v54 }
 0x20c   :  { %v1073_v31 = vpop.eup %1072  ;;  %v413_v32 = vpop.f32.mrf.mxu1 }
 0x20d   :  { %v440_v33 = vmul.f32 1.442695, %v427_v28  ;;  %802 = vst [vmem:[#allocation14 + $0x60] sm:$0xff] %v412_v29  ;;  %v414_v34 = vadd.f32 %v413_v32, %v1407_v52  ;;  %1001 = vmatprep.mubr.f32.mxu0 %v462_v30  ;;  %v455_v35 = vmul.f32 %v1073_v31, %v447_v27 }
 0x20e   :  { %v417_v36 = vpop.f32.mrf.mxu1 }
 0x20f   :  { %1080 = vpow2.f32 %v440_v33  ;;  %v428_v38 = vmul.f32 0.5, %v414_v34  ;;  %803 = vst [vmem:[#allocation14 + $0x68] sm:$0xff] %v414_v34  ;;  %v418_v39 = vadd.f32 %v417_v36, %v1405_v51  ;;  %v463_v40 = vadd.f32 %v455_v35, %v1412_v59 }
 0x210   :  { %v1075_v41 = vpop.eup %1074  ;;  %v419_v42 = vpop.f32.mrf.mxu1 }
 0x211   :  { %v442_v43 = vmul.f32 1.442695, %v428_v38  ;;  %804 = vst [vmem:[#allocation14 + $0x70] sm:$0xff] %v418_v39  ;;  %v420_v44 = vadd.f32 %v419_v42, %v1407_v52  ;;  %1002 = vmatmul.mubr.f32.vlgmr.msra.gmra.mxu0 %v463_v40  ;;  %v456_v45 = vmul.f32 %v1075_v41, %v448_v37  ;;  %v451_v52 = vld [vmem:[#allocation5 + $0x28] sm:$0xff] }
 0x213   :  { %1082 = vpow2.f32 %v442_v43  ;;  %v429_v47 = vmul.f32 0.5, %v420_v44  ;;  %805 = vst [vmem:[#allocation14 + $0x78] sm:$0xff] %v420_v44  ;;  %v464_v48 = vadd.f32 %v456_v45, %v1417_v1 }
 0x214   :  { %v1077_v49 = vpop.eup %1076 }
 0x215   :  { %v444_v50 = vmul.f32 1.442695, %v429_v47  ;;  %1004 = vmatprep.mubr.f32.mxu0 %v464_v48  ;;  %v457_v51 = vmul.f32 %v1077_v49, %v449_v46 }
 0x217   :  { %1084 = vpow2.f32 %v444_v50  ;;  %v465_v54 = vadd.f32 %v457_v51, %v1422_v7  ;;  %v607_v7 = vld [vmem:[#allocation11 + $0x8] sm:$0xff] }
 0x218   :  { %v1079_v55 = vpop.eup %1078  ;;  %1041 = vmatprep.subr.mxu1 %v607_v7 }
 0x219   :  { %1005 = vmatmul.mubr.f32.gmra.mxu0 %v465_v54  ;;  %v458_v56 = vmul.f32 %v1079_v55, %v450_v53  ;;  %1042 = vmatpush3.msra.mxu1 %v607_v7 }
 0x21a   :  { %1043 = vmatprep.subr.mxu1 %v606_v8 }
 0x21b   :  { %v466_v57 = vadd.f32 %v458_v56, %v400_v13  ;;  %1044 = vmatpush3.msra.mxu1 %v606_v8 }
 0x21c   :  { %v1081_v58 = vpop.eup %1080 }
 0x21d   :  { %1007 = vmatprep.mubr.f32.mxu0 %v466_v57  ;;  %v459_v59 = vmul.f32 %v1081_v58, %v451_v52 }
 0x21f   :  { %v467_v61 = vadd.f32 %v459_v59, %v406_v20 }
 0x220   :  { %v1083_v62 = vpop.eup %1082 }
 0x221   :  { %1008 = vmatmul.mubr.f32.gmra.mxu0 %v467_v61  ;;  %v460_v63 = vmul.f32 %v1083_v62, %v452_v60 }
 0x223   :  { %v468_v1 = vadd.f32 %v460_v63, %v412_v29 }
 0x224   :  { %v1085_v2 = vpop.eup %1084 }
 0x225   :  { %1010 = vmatprep.mubr.f32.mxu0 %v468_v1  ;;  %v461_v3 = vmul.f32 %v1085_v2, %v453_v0 }
 0x227   :  { %v469_v4 = vadd.f32 %v461_v3, %v418_v39 }
 0x229   :  { %1011 = vmatmul.mubr.f32.gmra.mxu0 %v469_v4 }
 0x2d1   :  { %v1003_v10 = vpop.f32.mrf.mxu0 }
 0x2d2   :  { %v565_v11 = vadd.f32 %v1003_v10, %v843_v9 }
 0x2d3   :  { %v559_v12 = vpop.f32.mrf.mxu0 }
 0x2d4   :  { %v560_v13 = vadd.f32 %v843_v9, %v559_v12  ;;  %v599_v15 = vmax.f32 %v565_v11, 0.0 }
 0x2d6   :  { %v598_v14 = vmax.f32 %v560_v13, 0.0 }
 0x2d8   :  { %1045 = vmatprep.mubr.f32.mxu1 %v598_v14 }
 0x2d9   :  { %v1006_v16 = vpop.f32.mrf.mxu0  ;;  %1046 = vmatmul.mubr.f32.vlgmr.msra.gmra.mxu1 %v599_v15 }
 0x2da   :  { %v575_v17 = vadd.f32 %v1006_v16, %v843_v9 }
 0x2db   :  { %v569_v18 = vpop.f32.mrf.mxu0 }
 0x2dc   :  { %v570_v19 = vadd.f32 %v843_v9, %v569_v18  ;;  %v601_v21 = vmax.f32 %v575_v17, 0.0 }
 0x2de   :  { %v600_v20 = vmax.f32 %v570_v19, 0.0 }
 0x2e0   :  { %1048 = vmatprep.mubr.f32.mxu1 %v600_v20 }
 0x2e1   :  { %v1009_v22 = vpop.f32.mrf.mxu0  ;;  %1049 = vmatmul.mubr.f32.gmra.mxu1 %v601_v21 }
 0x2e2   :  { %v585_v23 = vadd.f32 %v1009_v22, %v843_v9 }
 0x2e3   :  { %v579_v24 = vpop.f32.mrf.mxu0 }
 0x2e4   :  { %v580_v25 = vadd.f32 %v843_v9, %v579_v24  ;;  %v603_v27 = vmax.f32 %v585_v23, 0.0 }
 0x2e6   :  { %v602_v26 = vmax.f32 %v580_v25, 0.0 }
 0x2e8   :  { %1051 = vmatprep.mubr.f32.mxu1 %v602_v26 }
 0x2e9   :  { %v1012_v28 = vpop.f32.mrf.mxu0  ;;  %1052 = vmatmul.mubr.f32.gmra.mxu1 %v603_v27 }
 0x2ea   :  { %v595_v29 = vadd.f32 %v1012_v28, %v843_v9 }
 0x2eb   :  { %v589_v30 = vpop.f32.mrf.mxu0 }
 0x2ec   :  { %v590_v31 = vadd.f32 %v843_v9, %v589_v30  ;;  %v605_v33 = vmax.f32 %v595_v29, 0.0 }
 0x2ee   :  { %v604_v32 = vmax.f32 %v590_v31, 0.0 }
 0x2f0   :  { %1054 = vmatprep.mubr.f32.mxu1 %v604_v32 }
 0x2f1   :  { %1055 = vmatmul.mubr.f32.gmra.mxu1 %v605_v33 }
 0x2f2   :  { %1249 = shalt.err (!%p1246_p6)
}
 0x2f3   :  { %829 = dma.vmem_to_hbm [thread:$0]  %s824_s1, 2048, %s1466_s11, [#allocation15], %s1294_s27, %s1294_s27, %s1295_s28  }
 0x2f4   :  { %v844_v34 = vld [vmem:[%s1464_s9] ss:$0 sm:$0xff]  ;;  %s1302_s9 = smov [#allocation13]  }
 0x2f5   :  { %s811_s11 = sshll.u32 %s1302_s9, 4  ;;  %s812_s11 = int_to_ptr.vmem [resolvable:$true] %s811_s11 }
 0x2f6   :  { %s1258_s27 = scalar_lea.vmem %s812_s11, 1024  ;;  %p1263_p8 = scmp.lt.s32.totalorder %s812_s11, %s812_s11 }
 0x2f7   :  { %p1259_p7 = scmp.ne.s32.totalorder %s812_s11, %s1258_s27  ;;  %p1264_p9 = scmp.lt.s32.totalorder %s1258_s27, %s1258_s27 }
 0x2f9   :  { %p1265_p10 = por %p1264_p9, %p1263_p8 }
 0x2fb   :  { %p1266_p11 = pnand %p1265_p10, %p1259_p7 }
 0x399   :  { %v1047_v35 = vpop.f32.mrf.mxu1 }
 0x39a   :  { %v701_v36 = vadd.f32 %v1047_v35, %v844_v34 }
 0x39b   :  { %v695_v37 = vpop.f32.mrf.mxu1 }
 0x39c   :  { %v846_v38 = vmul.f32 -1.442695, %v701_v36  ;;  %v696_v39 = vadd.f32 %v844_v34, %v695_v37 }
 0x39e   :  { %1086 = vpow2.f32 %v846_v38  ;;  %v845_v40 = vmul.f32 -1.442695, %v696_v39 }
 0x3a0   :  { %1088 = vpow2.f32 %v845_v40 }
 0x3a1   :  { %v1050_v41 = vpop.f32.mrf.mxu1 }
 0x3a2   :  { %v711_v42 = vadd.f32 %v1050_v41, %v844_v34 }
 0x3a3   :  { %v705_v43 = vpop.f32.mrf.mxu1 }
 0x3a4   :  { %v848_v44 = vmul.f32 -1.442695, %v711_v42  ;;  %v706_v45 = vadd.f32 %v844_v34, %v705_v43 }
 0x3a6   :  { %1090 = vpow2.f32 %v848_v44  ;;  %v847_v46 = vmul.f32 -1.442695, %v706_v45 }
 0x3a8   :  { %1092 = vpow2.f32 %v847_v46 }
 0x3a9   :  { %v1053_v47 = vpop.f32.mrf.mxu1 }
 0x3aa   :  { %v721_v48 = vadd.f32 %v1053_v47, %v844_v34 }
 0x3ab   :  { %v1087_v49 = vpop.eup %1086  ;;  %v715_v50 = vpop.f32.mrf.mxu1 }
 0x3ac   :  { %v759_v51 = vadd.f32 1.0, %v1087_v49  ;;  %v850_v53 = vmul.f32 -1.442695, %v721_v48  ;;  %v716_v54 = vadd.f32 %v844_v34, %v715_v50 }
 0x3ad   :  { %v1089_v55 = vpop.eup %1088 }
 0x3ae   :  { %1094 = vrcp.f32 %v759_v51  ;;  %v758_v56 = vadd.f32 1.0, %v1089_v55  ;;  %v849_v52 = vmul.f32 -1.442695, %v716_v54 }
 0x3af   :  { %1096 = vpow2.f32 %v850_v53 }
 0x3b0   :  { %1098 = vrcp.f32 %v758_v56 }
 0x3b1   :  { %1100 = vpow2.f32 %v849_v52  ;;  %v1056_v57 = vpop.f32.mrf.mxu1 }
 0x3b2   :  { %v731_v58 = vadd.f32 %v1056_v57, %v844_v34 }
 0x3b3   :  { %v1091_v59 = vpop.eup %1090  ;;  %v725_v60 = vpop.f32.mrf.mxu1 }
 0x3b4   :  { %v761_v61 = vadd.f32 1.0, %v1091_v59  ;;  %v852_v62 = vmul.f32 -1.442695, %v731_v58  ;;  %v726_v63 = vadd.f32 %v844_v34, %v725_v60 }
 0x3b5   :  { %v1093_v0 = vpop.eup %1092 }
 0x3b6   :  { %1102 = vrcp.f32 %v761_v61  ;;  %v760_v1 = vadd.f32 1.0, %v1093_v0  ;;  %v851_v2 = vmul.f32 -1.442695, %v726_v63 }
 0x3b7   :  { %1104 = vpow2.f32 %v852_v62 }
 0x3b8   :  { %1106 = vrcp.f32 %v760_v1 }
 0x3b9   :  { %1108 = vpow2.f32 %v851_v2 }
 0x3bb   :  { %v1095_v3 = vpop.eup %1094 }
 0x3bc   :  { %v1097_v4 = vpop.eup %1096  ;;  %783 = vst [vmem:[#allocation13 + $0x8] sm:$0xff] %v1095_v3 }
 0x3bd   :  { %v1099_v5 = vpop.eup %1098  ;;  %v763_v6 = vadd.f32 1.0, %v1097_v4 }
 0x3be   :  { %v1101_v7 = vpop.eup %1100  ;;  %782 = vst [vmem:[#allocation13] sm:$0xff] %v1099_v5 }
 0x3bf   :  { %1110 = vrcp.f32 %v763_v6  ;;  %v762_v8 = vadd.f32 1.0, %v1101_v7 }
 0x3c1   :  { %1112 = vrcp.f32 %v762_v8 }
 0x3c3   :  { %v1103_v9 = vpop.eup %1102 }
 0x3c4   :  { %v1105_v10 = vpop.eup %1104  ;;  %785 = vst [vmem:[#allocation13 + $0x18] sm:$0xff] %v1103_v9 }
 0x3c5   :  { %v1107_v11 = vpop.eup %1106  ;;  %v765_v12 = vadd.f32 1.0, %v1105_v10 }
 0x3c6   :  { %v1109_v13 = vpop.eup %1108  ;;  %784 = vst [vmem:[#allocation13 + $0x10] sm:$0xff] %v1107_v11 }
 0x3c7   :  { %1114 = vrcp.f32 %v765_v12  ;;  %v764_v14 = vadd.f32 1.0, %v1109_v13 }
 0x3c9   :  { %1116 = vrcp.f32 %v764_v14 }
 0x3cc   :  { %v1111_v15 = vpop.eup %1110 }
 0x3cd   :  { %787 = vst [vmem:[#allocation13 + $0x28] sm:$0xff] %v1111_v15 }
 0x3ce   :  { %v1113_v16 = vpop.eup %1112 }
 0x3cf   :  { %786 = vst [vmem:[#allocation13 + $0x20] sm:$0xff] %v1113_v16 }
 0x3d4   :  { %v1115_v17 = vpop.eup %1114 }
 0x3d5   :  { %789 = vst [vmem:[#allocation13 + $0x38] sm:$0xff] %v1115_v17 }
 0x3d6   :  { %v1117_v18 = vpop.eup %1116 }
 0x3d7   :  { %788 = vst [vmem:[#allocation13 + $0x30] sm:$0xff] %v1117_v18 }
 0x3d8   :  { %1269 = shalt.err (!%p1266_p11)
}
 0x3d9   :  { %817 = dma.vmem_to_hbm [thread:$0]  %s812_s11, 1024, %s1465_s10, [#allocation4], %s1292_s22, %s1292_s22, %s1293_s23  }
 0x3da   :  { %1286 = dma.done.wait [#allocation4], 1024  }
 0x3db   :  { %1287 = vsyncadd [#allocation4], 4294966272 }
 0x3dc   :  { %1288 = dma.done.wait [#allocation15], 2048  }
 0x3dd   :  { %1289 = vsyncadd [#allocation15], 4294965248 }
 0x3de   :  { %836 = vsyncpa [#allocation3], 1 }
 0x3df   :  { %837 = vsyncpa [#allocation6], 1 }
 0x3e0   :  { %838 = vsyncpa [#allocation9], 1 }
 0x3e1   :  { %839 = vsyncpa [#allocation12], 1 }
 0x3e2   :  { %840 = vsyncpa [#allocation4], 1 }
 0x3e3   :  { %841 = vsyncpa [#allocation15], 1 }

</bundles_post_ra>
